<compile_context>
chip_gen: v6e
topology: v6e:2x2x1
jax: 0.10.0
libtpu: 0.0.40
codegen_flags: <defaults>
</compile_context>

<pallas_src>
import functools

import jax
import jax.numpy as jnp
from jax.experimental import pallas as pl
from jax.experimental.pallas import tpu as pltpu


def _round_up(x, m):
    return (x + m - 1) // m * m


# ----------------------------- Pallas kernel --------------------------------


def _cls_kernel(x_ref, m_ref, weff_ref, beff_ref, wproj_ref, bproj_ref,
                out_ref, *, seq_len, bt):
    """One batch tile (bt batch elements), time-major rows.

    x_ref    : (S, Bt, E)   bf16   input features (time-major within tile)
    m_ref    : (S, Bt, 1)   f32    x_mark_enc padding mask
    weff_ref : (E, Dp)      bf16   folded enc_embedding_n + bp_n weights
    beff_ref : (1, Dp)      f32    folded bias
    wproj_ref: (S, Dp, Cp)  bf16   projection weight, reshaped per timestep
    bproj_ref: (1, Cp)      f32
    out_ref  : (Bt, Cp)     f32
    """
    S, Bt = seq_len, bt
    E = x_ref.shape[-1]

    # Folded enc_embedding_n + bp_n chain: ONE MXU matmul (bf16 in, f32 acc).
    x = x_ref[...].reshape(S * Bt, E)
    h = jnp.dot(x, weff_ref[...], preferred_element_type=jnp.float32)
    h = h + beff_ref[...]

    # TODO(synk): F.gelu defaults to the exact erf GELU; the tanh
    # approximation is used here (EUP-friendly, ~1e-3 relative difference).
    h = jax.nn.gelu(h, approximate=True)

    # Dropout is identity in eval mode.  Padding mask: * x_mark_enc[..., None].
    h = h * m_ref[...].reshape(S * Bt, 1)

    # Projection Linear(S*D -> num_class), accumulated over timesteps.
    # Time-major rows make h3[s] a contiguous, 8-sublane-aligned slab, so each
    # slice is free (no XLU shuffles) and each dot fills the MXU M dimension.
    h3 = h.reshape(S, Bt, h.shape[-1])
    acc = jnp.zeros(out_ref.shape, jnp.float32)
    for s in range(S):                       # static unroll; S is a config
        acc += jnp.dot(h3[s].astype(jnp.bfloat16), wproj_ref[s],
                       preferred_element_type=jnp.float32)
    out_ref[...] = acc + bproj_ref[...]


# ------------------------------- Wrapper -------------------------------------


def _pick_batch_tile(B, S, E, Dp, Cp, *, target_rows=256, min_steps=2,
                     vmem_budget=40 << 20):
    """Batch tile: multiple of 8, <= target_rows (MXU M dim), >= min_steps grid
    steps when the batch allows (megacore), shrunk to fit a VMEM budget."""
    def tile_bytes(bt):
        # double-buffered per-step blocks + (also double-buffered) weight blocks
        return (2 * (S * bt * E * 2 + S * bt * 4 + bt * Cp * 4)
                + 2 * (E * Dp * 2 + Dp * 4 + S * Dp * Cp * 2 + Cp * 4))

    bt = min(_round_up(B, 8), target_rows)
    if _round_up(B, 8) > 8 and _round_up(B, bt) // bt < min_steps:
        bt = max(8, _round_up((B + min_steps - 1) // min_steps, 8))
    while bt > 8 and tile_bytes(bt) > vmem_budget:
        bt = max(8, _round_up(bt // 2, 8))
    return bt, tile_bytes(bt)


def model_classification(x_enc, x_mark_enc, params, *, e_layers):
    """x_enc: (B, S, E) f32, x_mark_enc: (B, S) f32 -> (B, num_class) f32."""
    B, S, E = x_enc.shape
    D = params["w_emb"].shape[1]
    C = params["w_proj"].shape[1]
    L = e_layers
    bf16, f32 = jnp.bfloat16, jnp.float32

    # Lane-dense padding (zero padding is exact end-to-end).
    Dp = _round_up(D, 128)
    Cp = _round_up(C, 128)

    # ---- fold the linear chain once, in f32 (weight-load time) -------------
    w_eff = params["w_emb"]                      # (E, D)
    b_eff = params["b_emb"]                      # (1, D)
    for l in range(L):
        w_eff = w_eff @ params["w_bp"][l]
        b_eff = b_eff @ params["w_bp"][l] + params["b_bp"][l]
    w_eff = jnp.pad(w_eff, ((0, 0), (0, Dp - D))).astype(bf16)
    b_eff = jnp.pad(b_eff, ((0, 0), (0, Dp - D))).astype(f32)
    # (S*D, C) -> (S, D, C) -> pad: row (s, d) matches h3[s][:, d] in-kernel,
    # which matches PyTorch's reshape(B, -1) flatten order (index s*D + d).
    w_proj = jnp.pad(params["w_proj"].reshape(S, D, C),
                     ((0, 0), (0, Dp - D), (0, Cp - C))).astype(bf16)
    b_proj = jnp.pad(params["b_proj"], ((0, 0), (0, Cp - C))).astype(f32)

    # ---- batch tiling + time-major activation layout ------------------------
    Bt, tile_bytes = _pick_batch_tile(B, S, E, Dp, Cp)
    Bp = _round_up(B, Bt)                       # zero-pad batch to tile multiple
    grid = (Bp // Bt,)

    x_tm = jnp.transpose(x_enc, (1, 0, 2))                      # (S, B, E)
    x_tm = jnp.pad(x_tm, ((0, 0), (0, Bp - B), (0, 0))).astype(bf16)
    m_tm = jnp.pad(x_mark_enc.T, ((0, 0), (0, Bp - B)))
    m_tm = m_tm.reshape(S, Bp, 1).astype(f32)

    kernel = functools.partial(_cls_kernel, seq_len=S, bt=Bt)

    flops = 2 * Bp * S * (E * Dp + Dp * Cp)
    bytes_accessed = (x_tm.size * 2 + m_tm.size * 4 + w_eff.size * 2
                      + b_eff.size * 4 + w_proj.size * 2 + b_proj.size * 4
                      + Bp * Cp * 4)
    # Explicit VMEM limit from chosen blocks (headroom, <= 48 MiB: safe on all
    # of v5e / v6e / v7x).
    vmem_limit = int(min(max(2 * tile_bytes + (4 << 20), 32 << 20), 48 << 20))

    out = pl.pallas_call(
        kernel,
        out_shape=jax.ShapeDtypeStruct((Bp, Cp), f32),
        grid_spec=pltpu.PrefetchScalarGridSpec(
            num_scalar_prefetch=0,
            grid=grid,
            in_specs=[
                pl.BlockSpec((S, Bt, E), lambda i: (0, i, 0)),
                pl.BlockSpec((S, Bt, 1), lambda i: (0, i, 0)),
                pl.BlockSpec((E, Dp), lambda i: (0, 0)),
                pl.BlockSpec((1, Dp), lambda i: (0, 0)),
                pl.BlockSpec((S, Dp, Cp), lambda i: (0, 0, 0)),
                pl.BlockSpec((1, Cp), lambda i: (0, 0)),
            ],
            out_specs=pl.BlockSpec((Bt, Cp), lambda i: (i, 0)),
        ),
        compiler_params=pltpu.CompilerParams(
            dimension_semantics=("parallel",),
            vmem_limit_bytes=vmem_limit),
        cost_estimate=pl.CostEstimate(
            flops=flops, transcendentals=Bp * S * Dp,
            bytes_accessed=bytes_accessed),
    )(x_tm, m_tm, w_eff, b_eff, w_proj, b_proj)

    return out[:B, :C]


# --------------------------- Parameter init ----------------------------------


def init_params(key, *, enc_in, d_model, seq_len, e_layers, num_class):
    ks = jax.random.split(key, 6)
    scale = 0.1
    return {
        # enc_embedding_n : Linear(enc_in, d_model)    -> stored (in, out)
        "w_emb": scale * jax.random.normal(ks[0], (enc_in, d_model), jnp.float32),
        "b_emb": scale * jax.random.normal(ks[1], (1, d_model), jnp.float32),
        # bp_n : e_layers x Linear(d_model, d_model)   -> stacked (L, in, out)
        "w_bp": scale * jax.random.normal(ks[2], (e_layers, d_model, d_model), jnp.float32),
        "b_bp": scale * jax.random.normal(ks[3], (e_layers, 1, d_model), jnp.float32),
        # projection : Linear(seq_len*d_model, num_class) -> stored (in, out)
        "w_proj": scale * jax.random.normal(ks[4], (seq_len * d_model, num_class), jnp.float32),
        "b_proj": scale * jax.random.normal(ks[5], (1, num_class), jnp.float32),
    }


# ------------------------------ Reference ------------------------------------


def reference_classification(x_enc, x_mark_enc, params, *, e_layers):
    """Pure-JAX f32 reference (layer-by-layer, PyTorch order of operations)."""
    B, S, E = x_enc.shape
    h = x_enc.reshape(B * S, E) @ params["w_emb"] + params["b_emb"]
    for l in range(e_layers):
        h = h @ params["w_bp"][l] + params["b_bp"][l]
    h = jax.nn.gelu(h, approximate=True)          # kernel uses tanh approx too
    h = h * x_mark_enc.reshape(B * S, 1)
    h = h.reshape(B, -1)                          # PyTorch flatten order (s*D + d)
    return h @ params["w_proj"] + params["b_proj"]


# --------------------------------- Main ---------------------------------------


if __name__ == "__main__":
    # batch, seq_len, enc_in, d_model, e_layers, num_class
    B, S, E, D, L, C = 16, 8, 4, 32, 2, 3

    key = jax.random.PRNGKey(0)
    k_x, k_m, k_p = jax.random.split(key, 3)

    x_enc = jax.random.normal(k_x, (B, S, E), jnp.float32)
    # x_mark_enc acts as a float padding mask in the classification path.
    x_mark_enc = (jax.random.uniform(k_m, (B, S)) > 0.2).astype(jnp.float32)

    params = init_params(k_p, enc_in=E, d_model=D, seq_len=S,
                         e_layers=L, num_class=C)

    out = model_classification(x_enc, x_mark_enc, params, e_layers=L)
    out = jax.block_until_ready(out)

    ref = reference_classification(x_enc, x_mark_enc, params, e_layers=L)
    assert out.shape == (B, C), out.shape
    assert jnp.allclose(out, ref, atol=1e-2, rtol=2e-2), (out, ref)

    print("KERNEL_OK")
</pallas_src>

<mosaic_0001>
module attributes {stable_mosaic.version = 11 : i64} {
  func.func @_cls_kernel(%arg0: i32, %arg1: memref<8x8x4xbf16, #tpu.memory_space<vmem>>, %arg2: memref<8x8x1xf32, #tpu.memory_space<vmem>>, %arg3: memref<4x128xbf16, #tpu.memory_space<vmem>>, %arg4: memref<1x128xf32, #tpu.memory_space<vmem>>, %arg5: memref<8x128x128xbf16, #tpu.memory_space<vmem>>, %arg6: memref<1x128xf32, #tpu.memory_space<vmem>>, %arg7: memref<8x128xf32, #tpu.memory_space<vmem>>) attributes {dimension_semantics = [#tpu.dimension_semantics<parallel>], iteration_bounds = array<i64: 2>, scalar_prefetch = 0 : i64, scratch_operands = 0 : i64, tpu.core_type = #tpu.core_type<tc>, window_params = [{transform_indices = @transform_0, window_bounds = array<i64: 8, 8, 4>}, {transform_indices = @transform_1, window_bounds = array<i64: 8, 8, 1>}, {pipeline_mode = #tpu.pipeline_mode<synchronous>, transform_indices = @transform_2, window_bounds = array<i64: 4, 128>}, {pipeline_mode = #tpu.pipeline_mode<synchronous>, transform_indices = @transform_3, window_bounds = array<i64: 1, 128>}, {pipeline_mode = #tpu.pipeline_mode<synchronous>, transform_indices = @transform_4, window_bounds = array<i64: 8, 128, 128>}, {pipeline_mode = #tpu.pipeline_mode<synchronous>, transform_indices = @transform_5, window_bounds = array<i64: 1, 128>}, {transform_indices = @transform_6, window_bounds = array<i64: 8, 128>}]} {
    %c0 = arith.constant 0 : index
    %c0_0 = arith.constant 0 : index
    %c0_1 = arith.constant 0 : index
    %0 = vector.load %arg1[%c0, %c0_0, %c0_1] : memref<8x8x4xbf16, #tpu.memory_space<vmem>>, vector<8x8x4xbf16>
    %1 = vector.shape_cast %0 : vector<8x8x4xbf16> to vector<64x4xbf16>
    %c0_2 = arith.constant 0 : index
    %c0_3 = arith.constant 0 : index
    %2 = vector.load %arg3[%c0_2, %c0_3] : memref<4x128xbf16, #tpu.memory_space<vmem>>, vector<4x128xbf16>
    %cst = arith.constant dense<0.000000e+00> : vector<64x128xf32>
    %3 = tpu.matmul %1, %2, %cst {dimension_numbers = #tpu.dot_dimension_numbers<[1], [0], [0], [1], [0, 0, 1, 1], [], []>} : vector<64x4xbf16>, vector<4x128xbf16>, vector<64x128xf32> -> vector<64x128xf32>
    %c0_4 = arith.constant 0 : index
    %c0_5 = arith.constant 0 : index
    %4 = vector.load %arg4[%c0_4, %c0_5] : memref<1x128xf32, #tpu.memory_space<vmem>>, vector<1x128xf32>
    %5 = vector.broadcast %4 : vector<1x128xf32> to vector<64x128xf32>
    %6 = arith.addf %3, %5 : vector<64x128xf32>
    %7 = arith.mulf %6, %6 : vector<64x128xf32>
    %8 = arith.mulf %6, %7 : vector<64x128xf32>
    %cst_6 = arith.constant 4.471500e-02 : f32
    %9 = vector.broadcast %cst_6 : f32 to vector<64x128xf32>
    %10 = arith.mulf %9, %8 : vector<64x128xf32>
    %11 = arith.addf %6, %10 : vector<64x128xf32>
    %cst_7 = arith.constant 0.797884583 : f32
    %12 = vector.broadcast %cst_7 : f32 to vector<64x128xf32>
    %13 = arith.mulf %12, %11 : vector<64x128xf32>
    %14 = math.tanh %13 : vector<64x128xf32>
    %cst_8 = arith.constant 1.000000e+00 : f32
    %15 = vector.broadcast %cst_8 : f32 to vector<64x128xf32>
    %16 = arith.addf %15, %14 : vector<64x128xf32>
    %cst_9 = arith.constant 5.000000e-01 : f32
    %17 = vector.broadcast %cst_9 : f32 to vector<64x128xf32>
    %18 = arith.mulf %17, %16 : vector<64x128xf32>
    %19 = arith.mulf %6, %18 : vector<64x128xf32>
    %c0_10 = arith.constant 0 : index
    %c0_11 = arith.constant 0 : index
    %c0_12 = arith.constant 0 : index
    %20 = vector.load %arg2[%c0_10, %c0_11, %c0_12] : memref<8x8x1xf32, #tpu.memory_space<vmem>>, vector<8x8x1xf32>
    %21 = vector.shape_cast %20 : vector<8x8x1xf32> to vector<64x1xf32>
    %22 = vector.broadcast %21 : vector<64x1xf32> to vector<64x128xf32>
    %23 = arith.mulf %19, %22 : vector<64x128xf32>
    %24 = vector.shape_cast %23 : vector<64x128xf32> to vector<8x8x128xf32>
    %cst_13 = arith.constant 0.000000e+00 : f32
    %25 = vector.broadcast %cst_13 : f32 to vector<8x128xf32>
    %26 = vector.extract_strided_slice %24 {offsets = [0, 0, 0], sizes = [1, 8, 128], strides = [1, 1, 1]} : vector<8x8x128xf32> to vector<1x8x128xf32>
    %27 = vector.shape_cast %26 : vector<1x8x128xf32> to vector<8x128xf32>
    %28 = arith.truncf %27 : vector<8x128xf32> to vector<8x128xbf16>
    %c0_14 = arith.constant 0 : index
    %c0_15 = arith.constant 0 : index
    %c0_16 = arith.constant 0 : index
    %29 = vector.load %arg5[%c0_14, %c0_15, %c0_16] : memref<8x128x128xbf16, #tpu.memory_space<vmem>>, vector<1x128x128xbf16>
    %30 = vector.shape_cast %29 : vector<1x128x128xbf16> to vector<128x128xbf16>
    %cst_17 = arith.constant dense<0.000000e+00> : vector<8x128xf32>
    %31 = tpu.matmul %28, %30, %cst_17 {dimension_numbers = #tpu.dot_dimension_numbers<[1], [0], [0], [1], [0, 0, 1, 1], [], []>} : vector<8x128xbf16>, vector<128x128xbf16>, vector<8x128xf32> -> vector<8x128xf32>
    %32 = arith.addf %25, %31 : vector<8x128xf32>
    %33 = vector.extract_strided_slice %24 {offsets = [1, 0, 0], sizes = [1, 8, 128], strides = [1, 1, 1]} : vector<8x8x128xf32> to vector<1x8x128xf32>
    %34 = vector.shape_cast %33 : vector<1x8x128xf32> to vector<8x128xf32>
    %35 = arith.truncf %34 : vector<8x128xf32> to vector<8x128xbf16>
    %c1 = arith.constant 1 : index
    %c0_18 = arith.constant 0 : index
    %c0_19 = arith.constant 0 : index
    %36 = vector.load %arg5[%c1, %c0_18, %c0_19] : memref<8x128x128xbf16, #tpu.memory_space<vmem>>, vector<1x128x128xbf16>
    %37 = vector.shape_cast %36 : vector<1x128x128xbf16> to vector<128x128xbf16>
    %cst_20 = arith.constant dense<0.000000e+00> : vector<8x128xf32>
    %38 = tpu.matmul %35, %37, %cst_20 {dimension_numbers = #tpu.dot_dimension_numbers<[1], [0], [0], [1], [0, 0, 1, 1], [], []>} : vector<8x128xbf16>, vector<128x128xbf16>, vector<8x128xf32> -> vector<8x128xf32>
    %39 = arith.addf %32, %38 : vector<8x128xf32>
    %40 = vector.extract_strided_slice %24 {offsets = [2, 0, 0], sizes = [1, 8, 128], strides = [1, 1, 1]} : vector<8x8x128xf32> to vector<1x8x128xf32>
    %41 = vector.shape_cast %40 : vector<1x8x128xf32> to vector<8x128xf32>
    %42 = arith.truncf %41 : vector<8x128xf32> to vector<8x128xbf16>
    %c2 = arith.constant 2 : index
    %c0_21 = arith.constant 0 : index
    %c0_22 = arith.constant 0 : index
    %43 = vector.load %arg5[%c2, %c0_21, %c0_22] : memref<8x128x128xbf16, #tpu.memory_space<vmem>>, vector<1x128x128xbf16>
    %44 = vector.shape_cast %43 : vector<1x128x128xbf16> to vector<128x128xbf16>
    %cst_23 = arith.constant dense<0.000000e+00> : vector<8x128xf32>
    %45 = tpu.matmul %42, %44, %cst_23 {dimension_numbers = #tpu.dot_dimension_numbers<[1], [0], [0], [1], [0, 0, 1, 1], [], []>} : vector<8x128xbf16>, vector<128x128xbf16>, vector<8x128xf32> -> vector<8x128xf32>
    %46 = arith.addf %39, %45 : vector<8x128xf32>
    %47 = vector.extract_strided_slice %24 {offsets = [3, 0, 0], sizes = [1, 8, 128], strides = [1, 1, 1]} : vector<8x8x128xf32> to vector<1x8x128xf32>
    %48 = vector.shape_cast %47 : vector<1x8x128xf32> to vector<8x128xf32>
    %49 = arith.truncf %48 : vector<8x128xf32> to vector<8x128xbf16>
    %c3 = arith.constant 3 : index
    %c0_24 = arith.constant 0 : index
    %c0_25 = arith.constant 0 : index
    %50 = vector.load %arg5[%c3, %c0_24, %c0_25] : memref<8x128x128xbf16, #tpu.memory_space<vmem>>, vector<1x128x128xbf16>
    %51 = vector.shape_cast %50 : vector<1x128x128xbf16> to vector<128x128xbf16>
    %cst_26 = arith.constant dense<0.000000e+00> : vector<8x128xf32>
    %52 = tpu.matmul %49, %51, %cst_26 {dimension_numbers = #tpu.dot_dimension_numbers<[1], [0], [0], [1], [0, 0, 1, 1], [], []>} : vector<8x128xbf16>, vector<128x128xbf16>, vector<8x128xf32> -> vector<8x128xf32>
    %53 = arith.addf %46, %52 : vector<8x128xf32>
    %54 = vector.extract_strided_slice %24 {offsets = [4, 0, 0], sizes = [1, 8, 128], strides = [1, 1, 1]} : vector<8x8x128xf32> to vector<1x8x128xf32>
    %55 = vector.shape_cast %54 : vector<1x8x128xf32> to vector<8x128xf32>
    %56 = arith.truncf %55 : vector<8x128xf32> to vector<8x128xbf16>
    %c4 = arith.constant 4 : index
    %c0_27 = arith.constant 0 : index
    %c0_28 = arith.constant 0 : index
    %57 = vector.load %arg5[%c4, %c0_27, %c0_28] : memref<8x128x128xbf16, #tpu.memory_space<vmem>>, vector<1x128x128xbf16>
    %58 = vector.shape_cast %57 : vector<1x128x128xbf16> to vector<128x128xbf16>
    %cst_29 = arith.constant dense<0.000000e+00> : vector<8x128xf32>
    %59 = tpu.matmul %56, %58, %cst_29 {dimension_numbers = #tpu.dot_dimension_numbers<[1], [0], [0], [1], [0, 0, 1, 1], [], []>} : vector<8x128xbf16>, vector<128x128xbf16>, vector<8x128xf32> -> vector<8x128xf32>
    %60 = arith.addf %53, %59 : vector<8x128xf32>
    %61 = vector.extract_strided_slice %24 {offsets = [5, 0, 0], sizes = [1, 8, 128], strides = [1, 1, 1]} : vector<8x8x128xf32> to vector<1x8x128xf32>
    %62 = vector.shape_cast %61 : vector<1x8x128xf32> to vector<8x128xf32>
    %63 = arith.truncf %62 : vector<8x128xf32> to vector<8x128xbf16>
    %c5 = arith.constant 5 : index
    %c0_30 = arith.constant 0 : index
    %c0_31 = arith.constant 0 : index
    %64 = vector.load %arg5[%c5, %c0_30, %c0_31] : memref<8x128x128xbf16, #tpu.memory_space<vmem>>, vector<1x128x128xbf16>
    %65 = vector.shape_cast %64 : vector<1x128x128xbf16> to vector<128x128xbf16>
    %cst_32 = arith.constant dense<0.000000e+00> : vector<8x128xf32>
    %66 = tpu.matmul %63, %65, %cst_32 {dimension_numbers = #tpu.dot_dimension_numbers<[1], [0], [0], [1], [0, 0, 1, 1], [], []>} : vector<8x128xbf16>, vector<128x128xbf16>, vector<8x128xf32> -> vector<8x128xf32>
    %67 = arith.addf %60, %66 : vector<8x128xf32>
    %68 = vector.extract_strided_slice %24 {offsets = [6, 0, 0], sizes = [1, 8, 128], strides = [1, 1, 1]} : vector<8x8x128xf32> to vector<1x8x128xf32>
    %69 = vector.shape_cast %68 : vector<1x8x128xf32> to vector<8x128xf32>
    %70 = arith.truncf %69 : vector<8x128xf32> to vector<8x128xbf16>
    %c6 = arith.constant 6 : index
    %c0_33 = arith.constant 0 : index
    %c0_34 = arith.constant 0 : index
    %71 = vector.load %arg5[%c6, %c0_33, %c0_34] : memref<8x128x128xbf16, #tpu.memory_space<vmem>>, vector<1x128x128xbf16>
    %72 = vector.shape_cast %71 : vector<1x128x128xbf16> to vector<128x128xbf16>
    %cst_35 = arith.constant dense<0.000000e+00> : vector<8x128xf32>
    %73 = tpu.matmul %70, %72, %cst_35 {dimension_numbers = #tpu.dot_dimension_numbers<[1], [0], [0], [1], [0, 0, 1, 1], [], []>} : vector<8x128xbf16>, vector<128x128xbf16>, vector<8x128xf32> -> vector<8x128xf32>
    %74 = arith.addf %67, %73 : vector<8x128xf32>
    %75 = vector.extract_strided_slice %24 {offsets = [7, 0, 0], sizes = [1, 8, 128], strides = [1, 1, 1]} : vector<8x8x128xf32> to vector<1x8x128xf32>
    %76 = vector.shape_cast %75 : vector<1x8x128xf32> to vector<8x128xf32>
    %77 = arith.truncf %76 : vector<8x128xf32> to vector<8x128xbf16>
    %c7 = arith.constant 7 : index
    %c0_36 = arith.constant 0 : index
    %c0_37 = arith.constant 0 : index
    %78 = vector.load %arg5[%c7, %c0_36, %c0_37] : memref<8x128x128xbf16, #tpu.memory_space<vmem>>, vector<1x128x128xbf16>
    %79 = vector.shape_cast %78 : vector<1x128x128xbf16> to vector<128x128xbf16>
    %cst_38 = arith.constant dense<0.000000e+00> : vector<8x128xf32>
    %80 = tpu.matmul %77, %79, %cst_38 {dimension_numbers = #tpu.dot_dimension_numbers<[1], [0], [0], [1], [0, 0, 1, 1], [], []>} : vector<8x128xbf16>, vector<128x128xbf16>, vector<8x128xf32> -> vector<8x128xf32>
    %81 = arith.addf %74, %80 : vector<8x128xf32>
    %c0_39 = arith.constant 0 : index
    %c0_40 = arith.constant 0 : index
    %82 = vector.load %arg6[%c0_39, %c0_40] : memref<1x128xf32, #tpu.memory_space<vmem>>, vector<1x128xf32>
    %83 = vector.broadcast %82 : vector<1x128xf32> to vector<8x128xf32>
    %84 = arith.addf %81, %83 : vector<8x128xf32>
    %c0_41 = arith.constant 0 : index
    %c0_42 = arith.constant 0 : index
    %85 = vector.load %arg7[%c0_41, %c0_42] : memref<8x128xf32, #tpu.memory_space<vmem>>, vector<8x128xf32>
    tpu.vector_store %arg7[%c0_41, %c0_42], %84 {strides = array<i32>} : memref<8x128xf32, #tpu.memory_space<vmem>>, vector<8x128xf32>,
    return
  }
  func.func @transform_0(%arg0: i32) -> (i32, i32, i32) {
    %c0_i32 = arith.constant 0 : i32
    %c0_i32_0 = arith.constant 0 : i32
    %c0_i32_1 = arith.constant 0 : i32
    return %c0_i32, %arg0, %c0_i32_0 : i32, i32, i32
  }
  func.func @transform_1(%arg0: i32) -> (i32, i32, i32) {
    %c0_i32 = arith.constant 0 : i32
    %c0_i32_0 = arith.constant 0 : i32
    %c0_i32_1 = arith.constant 0 : i32
    return %c0_i32, %arg0, %c0_i32_0 : i32, i32, i32
  }
  func.func @transform_2(%arg0: i32) -> (i32, i32) {
    %c0_i32 = arith.constant 0 : i32
    %c0_i32_0 = arith.constant 0 : i32
    %c0_i32_1 = arith.constant 0 : i32
    return %c0_i32, %c0_i32_0 : i32, i32
  }
  func.func @transform_3(%arg0: i32) -> (i32, i32) {
    %c0_i32 = arith.constant 0 : i32
    %c0_i32_0 = arith.constant 0 : i32
    %c0_i32_1 = arith.constant 0 : i32
    return %c0_i32, %c0_i32_0 : i32, i32
  }
  func.func @transform_4(%arg0: i32) -> (i32, i32, i32) {
    %c0_i32 = arith.constant 0 : i32
    %c0_i32_0 = arith.constant 0 : i32
    %c0_i32_1 = arith.constant 0 : i32
    %c0_i32_2 = arith.constant 0 : i32
    return %c0_i32, %c0_i32_0, %c0_i32_1 : i32, i32, i32
  }
  func.func @transform_5(%arg0: i32) -> (i32, i32) {
    %c0_i32 = arith.constant 0 : i32
    %c0_i32_0 = arith.constant 0 : i32
    %c0_i32_1 = arith.constant 0 : i32
    return %c0_i32, %c0_i32_0 : i32, i32
  }
  func.func @transform_6(%arg0: i32) -> (i32, i32) {
    %c0_i32 = arith.constant 0 : i32
    %c0_i32_0 = arith.constant 0 : i32
    return %arg0, %c0_i32 : i32, i32
  }
}

</mosaic_0001>

<bundles_post_ra>
// kernel: tpu_custom_call.1
= control target key start
LH: loop header
LB: loop body
LE: loop exit
PB: predicated region body
PF: predicated region fallthrough
CT: control target
= control target key end

     0   :  { %11 = vsyncpa [#allocation5], 0  ;;  %s2547_s0 = inlined_call_operand.vmem [shape: bf16[8,16,4], index: 0, kind: input, shape index: {}]   ;;  %s2548_s1 = inlined_call_operand.vmem [shape: f32[8,16,1], index: 1, kind: input, shape index: {}]   ;;  %s2549_s2 = inlined_call_operand.vmem [shape: bf16[4,128], index: 2, kind: input, shape index: {}]   ;;  %s2550_s3 = inlined_call_operand.vmem [shape: f32[1,128], index: 3, kind: input, shape index: {}]   ;;  %s2551_s4 = inlined_call_operand.hbm [shape: bf16[8,128,128], index: 4, kind: input, shape index: {}]   ;;  %s2552_s5 = inlined_call_operand.vmem [shape: f32[1,128], index: 5, kind: input, shape index: {}]   ;;  %s2553_s6 = inlined_call_operand.hbm [shape: f32[16,128], index: 6, kind: output, shape index: {}]  }
   0x1   :  { %12 = vsyncpa [#allocation6], 0 }
   0x2   :  { %14 = vsyncpa [#allocation6 + $0x1], 0  ;;  %s2251_s21 = smov 0   ;;  %s2253_s22 = smov 0  }
   0x3   :  { %s2255_s23 = smov 0   ;;  %s2257_s24 = smov 0  }
   0x4 LB: > { %s2272_s25 = sadd.s32 4294967295, %s2207_s24   ;;  %s1637_s26 = sadd.s32 4294967294, %s2207_s24   ;;  %s2207_s24 = sphi %s2257_s24, %s2564_s24   ;;  %s2203_s23 = sphi %s2255_s23, %s2563_s23   ;;  %s2199_s22 = sphi %s2253_s22, %s2562_s22   ;;  %s2195_s21 = sphi %s2251_s21, %s2561_s21  }
   0x5   : > { %s2276_s27 = sadd.s32 1, %s2207_s24   ;;  %s27_s28 = sadd.s32 1, %s2203_s23 }
   0x6   : > { %s24_s29 = ssub.s32 %s2207_s24, %s2276_s27  ;;  %p34_p0 = scmp.ne.s32.totalorder %s2203_s23, %s2199_s22 }
   0x7   : > { %p25_p1 = scmp.eq.s32.totalorder %s24_s29, 0  ;;  %p35_p2 = scmp.eq.s32.totalorder %s2207_s24, 0 }
   0x8   : > { %p174_p3 = scmp.eq.s32.totalorder %s2272_s25, 1  ;;  %p179_p4 = scmp.ne.s32.totalorder %s2199_s22, %s2195_s21 }
   0x9   : > { %s2288_s30 = scalar_select %p25_p1, %s2203_s23, %s27_s28  }
   0xa   : > { %p2290_p5 = por %p35_p2, %p34_p0  ;;  %p2294_p6 = por %p174_p3, %p34_p0 }
   0xb   : > { %p180_p7 = scmp.eq.s32.totalorder %s1637_s26, 1  ;;  %p1638_p8 = scmp.ge.s32.totalorder %s2207_s24, 1 }
   0xc   : > { %s2556_s8 = scalar_select %p2294_p6, 1, 0 }
   0xd   : > { %p187_p9 = scmp.lt.s32.totalorder %s2207_s24, 3  ;;  %p2300_p10 = por %p180_p7, %p179_p4 }
   0xe   : > { %p1990_p11 = scmp.eq.s32.totalorder %s2272_s25, 0  ;;  %s2209_s11 = smov [#allocation4]  }
   0xf   : > { %s2557_s9 = scalar_select %p2300_p10, 1, 0 }
  0x10   : > { %p2305_p12 = pnand %p1638_p8, %p187_p9  ;;  %s205_s12 = sshll.u32 %s2209_s11, 4  ;;  %s206_s12 = int_to_ptr.vmem [resolvable:$true] %s205_s12 }
  0x11   : > { %s2128_s13 = scalar_lea.vmem %s206_s12, 8192  ;;  %p2136_p7 = scmp.lt.s32.totalorder %s206_s12, %s206_s12 }
  0x12   : > { %p1982_p13 = pneg %p2305_p12  ;;  %p2129_p2 = scmp.ne.s32.totalorder %s206_s12, %s2128_s13 }
  0x13   : > { %p2137_p10 = scmp.lt.s32.totalorder %s2128_s13, %s2128_s13 }
  0x14   : > { %p1983_p0 = pnand %p1990_p11, %p1982_p13 }
  0x15   : > { %p2138_p6 = por %p2137_p10, %p2136_p7 }
  0x16   : > { %p2119_p1 = pneg %p1983_p0 }
  0x18   : > { %p2131_p3 = pnand %p2129_p2, %p2119_p1 }
  0x1a   : > { %p2132_p4 = pneg %p2131_p3 }
  0x1c   : > { %p2139_p8 = pnand %p2138_p6, %p2132_p4 }
  0x1e   : > { %2142 = shalt.err (!%p2139_p8)
}
  0x1f   : > { %s2210_s14 = smov 64   ;;  %s2211_s15 = smov 4  }
  0x20   : > { %1985 = dma.hbm_to_vmem [thread:$0]  (!%p1983_p0), %s2551_s4, 8192, %s206_s12, [#allocation5], %s2210_s14, %s2210_s14, %s2211_s15  }
  0x21   : > { %p1640_p9 = scmp.ge.s32.totalorder %s2207_s24, 2 }
  0x23   : > { %218 = sbr.rel (%p1640_p9) target bundleno = 57 (0x39), region = 32 }
  0x28   : > { %221 = sbr.rel (!%p2290_p5) target bundleno = 49 (0x31), region = 36  ;;  %s223_s18 = sand.u32 (%p2290_p5), 1, %s2203_s23  }
  0x29   : > { %s1642_s19 = sshll.u32 (%p2290_p5), %s2207_s24, 2  ;;  %s1641_s20 = sshll.u32 (%p2290_p5), %s223_s18, 5 }
  0x2a   : > { %s227_s29 = scalar_lea.vmem (%p2290_p5), %s2547_s0, %s1642_s19  ;;  %s225_s11 = scalar_lea.vmem (%p2290_p5), [#allocation2], %s1641_s20 }
  0x2b   : > { %v244_v0 = vld [vmem:[%s227_s29] sm:$0xf] (%p2290_p5)  ;;  %v246_v1 = vld [vmem:[%s227_s29 + $0x8] sm:$0xf] (%p2290_p5)  ;;  %v248_v2 = vld [vmem:[%s227_s29 + $0x10] sm:$0xf] (%p2290_p5) }
  0x2c   : > { %245 = vst [vmem:[%s225_s11] sm:$0xf] (%p2290_p5), %v244_v0  ;;  %247 = vst [vmem:[%s225_s11 + $0x4] sm:$0xf] (%p2290_p5), %v246_v1  ;;  %v250_v3 = vld [vmem:[%s227_s29 + $0x18] sm:$0xf] (%p2290_p5) }
  0x2d   : > { %v252_v4 = vld [vmem:[%s227_s29 + $0x20] sm:$0xf]  ;;  %249 = vst [vmem:[%s225_s11 + $0x8] sm:$0xf] %v248_v2  ;;  %251 = vst [vmem:[%s225_s11 + $0xc] sm:$0xf] %v250_v3 }
  0x2e   : > { %253 = vst [vmem:[%s225_s11 + $0x10] sm:$0xf] %v252_v4  ;;  %v254_v5 = vld [vmem:[%s227_s29 + $0x28] sm:$0xf]  ;;  %v256_v6 = vld [vmem:[%s227_s29 + $0x30] sm:$0xf] }
  0x2f   : > { %v258_v7 = vld [vmem:[%s227_s29 + $0x38] sm:$0xf]  ;;  %255 = vst [vmem:[%s225_s11 + $0x14] sm:$0xf] %v254_v5  ;;  %257 = vst [vmem:[%s225_s11 + $0x18] sm:$0xf] %v256_v6 }
  0x30   : > { %259 = vst [vmem:[%s225_s11 + $0x1c] sm:$0xf] %v258_v7 }
  0x31 PF: > { %299 = sbr.rel (!%p2290_p5) target bundleno = 57 (0x39), region = 77  ;;  %s301_s12 = sand.u32 (%p2290_p5), 1, %s2203_s23  }
  0x32   : > { %s1644_s13 = sshll.u32 (%p2290_p5), %s2207_s24, 3  ;;  %s1643_s14 = sshll.u32 (%p2290_p5), %s301_s12, 6 }
  0x33   : > { %s305_s17 = scalar_lea.vmem (%p2290_p5), %s2548_s1, %s1644_s13  ;;  %s303_s18 = scalar_lea.vmem (%p2290_p5), [#allocation3], %s1643_s14 }
  0x34   : > { %v348_v8 = vld [vmem:[%s305_s17] sm:$0xff] (%p2290_p5)  ;;  %v350_v9 = vld [vmem:[%s305_s17 + $0x10] sm:$0xff] (%p2290_p5) }
  0x35   : > { %v352_v10 = vld [vmem:[%s305_s17 + $0x20] sm:$0xff] (%p2290_p5)  ;;  %349 = vst [vmem:[%s303_s18] sm:$0xff] (%p2290_p5), %v348_v8  ;;  %351 = vst [vmem:[%s303_s18 + $0x8] sm:$0xff] (%p2290_p5), %v350_v9  ;;  %v354_v11 = vld [vmem:[%s305_s17 + $0x30] sm:$0xff] (%p2290_p5) }
  0x36   : > { %353 = vst [vmem:[%s303_s18 + $0x10] sm:$0xff] %v352_v10  ;;  %v356_v12 = vld [vmem:[%s305_s17 + $0x40] sm:$0xff]  ;;  %v358_v13 = vld [vmem:[%s305_s17 + $0x50] sm:$0xff]  ;;  %355 = vst [vmem:[%s303_s18 + $0x18] sm:$0xff] %v354_v11 }
  0x37   : > { %357 = vst [vmem:[%s303_s18 + $0x20] sm:$0xff] %v356_v12  ;;  %359 = vst [vmem:[%s303_s18 + $0x28] sm:$0xff] %v358_v13  ;;  %v360_v14 = vld [vmem:[%s305_s17 + $0x60] sm:$0xff]  ;;  %v362_v15 = vld [vmem:[%s305_s17 + $0x70] sm:$0xff] }
  0x38   : > { %361 = vst [vmem:[%s303_s18 + $0x30] sm:$0xff] %v360_v14  ;;  %363 = vst [vmem:[%s303_s18 + $0x38] sm:$0xff] %v362_v15 }
  0x39 PF: > { %372 = sbr.rel (%p2305_p12) target bundleno = 612 (0x264), region = 115  ;;  %s2336_s7 = sand.u32 (!%p2305_p12), 1, %s2199_s22  }
  0x3a   : > { %s1646_s19 = sshll.u32 (!%p2305_p12), %s2336_s7, 5  ;;  %s1647_s20 = sshll.u32 (!%p2305_p12), %s2336_s7, 6 }
  0x3b   : > { %s377_s26 = scalar_lea.vmem (!%p2305_p12), [#allocation2], %s1646_s19  ;;  %s2340_s28 = scalar_lea.vmem (!%p2305_p12), [#allocation3], %s1647_s20 }
  0x3e   : > { %2186 = dma.done.wait (%p1990_p11), [#allocation5], 8192  }
  0x3f   : > { %2188 = vsyncadd (%p1990_p11), [#allocation5], 4294959104  ;;  %v2212_v16 = vmov 0   ;;  %vm469_vm0 = vcmask 1041408   ;;  %vm456_vm1 = vcmask 31744   ;;  %v2033_v19 = vld [vmem:[%s377_s26] sm:$0xff]  }
  0x40   : > { %2031 = vset.pattern.permute.xlu0 %v2212_v16  ;;  %2032 = vset.pattern.permute.xlu1 %v2212_v16  ;;  %v428_v17 = vld [vmem:[%s2549_s2] sm:$0x3]  ;;  %v2034_v20 = vld [vmem:[%s377_s26 + $0x8] sm:$0xff]   ;;  %v2035_v21 = vld [vmem:[%s377_s26 + $0x10] sm:$0xff]   ;;  %v2213_v32 = vmov 0.0   ;;  %vm2214_vm2 = vmmov 0  }
  0x41   : > { %1975 = vmatprep.subr.msk.bf16.mxu0 %vm469_vm0, %v428_v17  ;;  %v471_v18 = vsel %vm469_vm0, %v428_v17, 0  ;;  %1807 = vmatprep.mubr.msk.bf16.mxu0 %vm456_vm1, %v2033_v19  ;;  %v611_v22 = vld [vmem:[%s2340_s28 + $0x8] sm:$0xff]  ;;  %v612_v23 = vld [vmem:[%s2340_s28 + $0x10] sm:$0xff]  ;;  %v610_v24 = vld [vmem:[%s2340_s28] sm:$0xff]  ;;  %s1649_s13 = sshll.u32 %s2336_s7, 3  ;;  %s1725_s16 = sshll.u32 %s2272_s25, 7 }
  0x42   : > { %1806 = vmatpush3.bf16.msra.mxu0 %v471_v18  ;;  %625 = vperm.xlu0 %2031, %v611_v22   ;;  %v613_v25 = vld [vmem:[%s2340_s28 + $0x18] sm:$0xff]  ;;  %v614_v27 = vld [vmem:[%s2340_s28 + $0x20] sm:$0xff]  ;;  %v615_v28 = vld [vmem:[%s2340_s28 + $0x28] sm:$0xff]  ;;  %s418_s17 = scalar_lea.vmem [#allocation7], %s1649_s13  ;;  %p2559_p6 = scmp.ne.s32.totalorder %s2556_s8, 0 }
  0x43   : > { %630 = vperm.xlu1 %2032, %v612_v23   ;;  %v2036_v26 = vld [vmem:[%s377_s26 + $0x18] sm:$0xff]   ;;  %v616_v29 = vld [vmem:[%s2340_s28 + $0x30] sm:$0xff]  ;;  %1835 = vmatprep.subr.bf16.mxu0 %v2213_v32  ;;  %v2041_v36 = vld [vmem:[#allocation4 + $0x28] sm:$0xff]   ;;  %s1542_s18 = sshll.u32 %s418_s17, 4  ;;  %s2510_s26 = scalar_lea.hbm %s2553_s6, %s1725_s16  ;;  %s1543_s18 = int_to_ptr.vmem [resolvable:$true] %s1542_s18 }
  0x44   : > { %v617_v30 = vld [vmem:[%s2340_s28 + $0x38] sm:$0xff]  ;;  %1815 = vmatprep.subr.bf16.mxu1 %v2213_v32  ;;  %v2039_v34 = vld [vmem:[#allocation4 + $0x30] sm:$0xff]   ;;  %v2042_v37 = vld [vmem:[#allocation4 + $0x68] sm:$0xff]   ;;  %1831 = vmatprep.mubr.msk.bf16.mxu1 %vm2214_vm2, %v2213_v32  ;;  %s1529_s28 = scalar_lea.sflag [#allocation6], %s2336_s7  ;;  %s2143_s10 = scalar_lea.vmem %s1543_s18, 128 }
  0x45   : > { %1808 = vmatmul.mubr.msk.bf16.vlgmr.msra.gmra.mxu0 %vm456_vm1, %v2034_v20  ;;  %v2037_v31 = vld [vmem:[#allocation4 + $0x38] sm:$0xff]   ;;  %v2040_v35 = vld [vmem:[#allocation4 + $0x70] sm:$0xff]   ;;  %v2043_v38 = vld [vmem:[#allocation4 + $0x20] sm:$0xff]   ;;  %p2144_p5 = scmp.ne.s32.totalorder %s1543_s18, %s2143_s10  ;;  %s2215_s25 = smov [#allocation7]  }
  0x46   : > { %1811 = vmatprep.mubr.msk.bf16.mxu0 %vm456_vm1, %v2035_v21  ;;  %620 = vperm.xlu0 %2031, %v610_v24   ;;  %v2038_v33 = vld [vmem:[#allocation4 + $0x78] sm:$0xff]   ;;  %v2044_v39 = vld [vmem:[#allocation4 + $0x60] sm:$0xff]   ;;  %v2047_v42 = vld [vmem:[#allocation4 + $0x10] sm:$0xff]   ;;  %s2147_s29 = sshll.u32 %s2215_s25, 4  ;;  %s2148_s29 = int_to_ptr.vmem [resolvable:$false] %s2147_s29 }
  0x47   : > { %635 = vperm.xlu1 %2032, %v613_v25   ;;  %1836 = vmatpush3.bf16.msra.mxu0 %v2037_v31  ;;  %v2045_v40 = vld [vmem:[#allocation4 + $0x18] sm:$0xff]   ;;  %v2048_v43 = vld [vmem:[#allocation4 + $0x50] sm:$0xff]   ;;  %v2049_v44 = vld [vmem:[#allocation4 + $0x8] sm:$0xff]   ;;  %p2145_p10 = pnand %p2144_p5, %p2559_p6  ;;  %s2149_s11 = scalar_lea.vmem %s2148_s29, 256 }
  0x48   : > { %1837 = vmatprep.subr.bf16.mxu0 %v2213_v32  ;;  %1816 = vmatpush3.bf16.msra.mxu1 %v2038_v33  ;;  %v2046_v41 = vld [vmem:[#allocation4 + $0x58] sm:$0xff]   ;;  %v2050_v45 = vld [vmem:[#allocation4 + $0x48] sm:$0xff]   ;;  %v2051_v46 = vld [vmem:[#allocation4] sm:$0xff]   ;;  %p2150_p12 = scmp.lt.s32.totalorder %s1543_s18, %s2148_s29  ;;  %p2151_p13 = scmp.lt.s32.totalorder %s2149_s11, %s2143_s10 }
  0x49   : > { %1817 = vmatprep.subr.bf16.mxu1 %v2213_v32  ;;  %v2052_v47 = vld [vmem:[#allocation4 + $0x40] sm:$0xff]   ;;  %v2053_v24 = vld [vmem:[#allocation4 + $0xf8] sm:$0xff]   ;;  %v2055_v31 = vld [vmem:[#allocation4 + $0xf0] sm:$0xff]   ;;  %p2146_p11 = pneg %p2145_p10 }
  0x4a   : > { %640 = vperm.xlu0 %2031, %v614_v27   ;;  %v2386_v49 = vld [vmem:[%s2550_s3] ss:$0 sm:$0xff]  ;;  %p2152_p0 = por %p2151_p13, %p2150_p12 }
  0x4b   : > { %645 = vperm.xlu1 %2032, %v615_v28   ;;  %1838 = vmatpush3.bf16.msra.mxu0 %v2039_v34 }
  0x4c   : > { %1839 = vmatprep.subr.bf16.mxu0 %v2213_v32  ;;  %1818 = vmatpush3.bf16.msra.mxu1 %v2040_v35  ;;  %v2056_v35 = vld [vmem:[#allocation4 + $0xb0] sm:$0xff]   ;;  %p2153_p1 = pnand %p2152_p0, %p2146_p11 }
  0x4d   : > { %1812 = vmatmul.mubr.msk.bf16.gmra.mxu0 %vm456_vm1, %v2036_v26  ;;  %1819 = vmatprep.subr.bf16.mxu1 %v2213_v32 }
  0x4e   : > { %650 = vperm.xlu0 %2031, %v616_v29   ;;  %1851 = vmatprep.mubr.msk.bf16.mxu0 %vm2214_vm2, %v2213_v32 }
  0x4f   : > { %655 = vperm.xlu1 %2032, %v617_v30   ;;  %1840 = vmatpush3.bf16.msra.mxu0 %v2041_v36  ;;  %v2054_v30 = vld [vmem:[#allocation4 + $0xb8] sm:$0xff]   ;;  %v2057_v36 = vld [vmem:[#allocation4 + $0xe8] sm:$0xff]  }
  0x50   : > { %1841 = vmatprep.subr.bf16.mxu0 %v2213_v32  ;;  %1820 = vmatpush3.bf16.msra.mxu1 %v2042_v37 }
  0x51   : > { %1821 = vmatprep.subr.bf16.mxu1 %v2213_v32 }
  0x53   : > { %1842 = vmatpush3.bf16.msra.mxu0 %v2043_v38  ;;  %v2058_v38 = vld [vmem:[#allocation4 + $0xa8] sm:$0xff]  }
  0x54   : > { %1843 = vmatprep.subr.bf16.mxu0 %v2213_v32  ;;  %1822 = vmatpush3.bf16.msra.mxu1 %v2044_v39  ;;  %v2059_v39 = vld [vmem:[#allocation4 + $0xe0] sm:$0xff]  }
  0x55   : > { %1823 = vmatprep.subr.bf16.mxu1 %v2213_v32 }
  0x57   : > { %1844 = vmatpush3.bf16.msra.mxu0 %v2045_v40 }
  0x58   : > { %1845 = vmatprep.subr.bf16.mxu0 %v2213_v32  ;;  %1824 = vmatpush3.bf16.msra.mxu1 %v2046_v41 }
  0x59   : > { %1825 = vmatprep.subr.bf16.mxu1 %v2213_v32 }
  0x5b   : > { %1846 = vmatpush3.bf16.msra.mxu0 %v2047_v42 }
  0x5c   : > { %1847 = vmatprep.subr.bf16.mxu0 %v2213_v32  ;;  %1826 = vmatpush3.bf16.msra.mxu1 %v2048_v43  ;;  %v2060_v43 = vld [vmem:[#allocation4 + $0xa0] sm:$0xff]  }
  0x5d   : > { %1827 = vmatprep.subr.bf16.mxu1 %v2213_v32 }
  0x5f   : > { %1848 = vmatpush3.bf16.msra.mxu0 %v2049_v44  ;;  %v2061_v44 = vld [vmem:[#allocation4 + $0xd8] sm:$0xff]  }
  0x60   : > { %1849 = vmatprep.subr.bf16.mxu0 %v2213_v32  ;;  %1828 = vmatpush3.bf16.msra.mxu1 %v2050_v45 }
  0x61   : > { %1829 = vmatprep.subr.bf16.mxu1 %v2213_v32 }
  0x63   : > { %1850 = vmatpush3.bf16.msra.mxu0 %v2051_v46 }
  0x64   : > { %1875 = vmatprep.subr.bf16.mxu0 %v2213_v32  ;;  %1830 = vmatpush3.bf16.msra.mxu1 %v2052_v47 }
  0x65   : > { %1855 = vmatprep.subr.bf16.mxu1 %v2213_v32 }
  0xbd   : > { %v626_v9 = vpop.permute.xlu0 %625 }
  0xc1   : > { %v621_v20 = vpop.permute.xlu0 %620 }
 0x105   : > { %v1809_v48 = vpop.f32.mrf.mxu0 }
 0x106   : > { %v2394_v1 = vadd.f32 %v1809_v48, %v2386_v49 }
 0x107   : > { %v507_v50 = vpop.f32.mrf.mxu0 }
 0x108   : > { %v508_v51 = vadd.f32 %v2386_v49, %v507_v50  ;;  %v540_v4 = vmul.f32 %v2394_v1, %v2394_v1  ;;  %v631_v50 = vpop.permute.xlu1 %630 }
 0x109   : > { %v1810_v52 = vpop.f32.mrf.mxu0 }
 0x10a   : > { %v538_v53 = vmul.f32 %v508_v51, %v508_v51  ;;  %v2391_v61 = vadd.f32 %v1810_v52, %v2386_v49  ;;  %v548_v6 = vmul.f32 %v540_v4, %v2394_v1  ;;  %v2063_v52 = vld [vmem:[#allocation4 + $0xd0] sm:$0xff]  }
 0x10b   : > { %v510_v54 = vpop.f32.mrf.mxu0 }
 0x10c   : > { %v546_v55 = vmul.f32 %v538_v53, %v508_v51  ;;  %v511_v56 = vadd.f32 %v2386_v49, %v510_v54  ;;  %v541_v2 = vmul.f32 %v2391_v61, %v2391_v61  ;;  %v556_v10 = vmul.f32 0.044715, %v548_v6 }
 0x10d   : > { %v2403_v15 = vpop.f32.mrf.mxu0 }
 0x10e   : > { %v554_v57 = vmul.f32 0.044715, %v546_v55  ;;  %v539_v58 = vmul.f32 %v511_v56, %v511_v56  ;;  %v549_v5 = vmul.f32 %v541_v2, %v2391_v61  ;;  %v564_v16 = vadd.f32 %v556_v10, %v2394_v1  ;;  %v2066_v2 = vld [vmem:[#allocation4 + $0x88] sm:$0xff]  }
 0x10f   : > { %v523_v23 = vpop.f32.mrf.mxu0 }
 0x110   : > { %v562_v59 = vadd.f32 %v554_v57, %v508_v51  ;;  %v547_v60 = vmul.f32 %v539_v58, %v511_v56  ;;  %v557_v7 = vmul.f32 0.044715, %v549_v5  ;;  %v572_v27 = vmul.f32 0.7978846, %v564_v16  ;;  %v2064_v57 = vld [vmem:[#allocation4 + $0x90] sm:$0xff]   ;;  %v2065_v58 = vld [vmem:[#allocation4 + $0xc8] sm:$0xff]  }
 0x111   : > { %v2406_v28 = vpop.f32.mrf.mxu0  ;;  %v2419_v40 = vadd.f32 %v2386_v49, %v523_v23  ;;  %v2073_v16 = vld [vmem:[#allocation4 + $0x168] sm:$0xff]   ;;  %v2076_v23 = vld [vmem:[#allocation4 + $0x120] sm:$0xff]  }
 0x112   : > { %v555_v62 = vmul.f32 0.044715, %v547_v60  ;;  %v570_v63 = vmul.f32 0.7978846, %v562_v59  ;;  %v565_v11 = vadd.f32 %v557_v7, %v2391_v61 }
 0x113   : > { %v526_v34 = vpop.f32.mrf.mxu0  ;;  %v542_v45 = vmul.f32 %v2419_v40, %v2419_v40 }
 0x114   : > { %v563_v0 = vadd.f32 %v555_v62, %v511_v56  ;;  %2101 = vtanh.f32 %v570_v63  ;;  %v573_v19 = vmul.f32 0.7978846, %v565_v11  ;;  %v2412_v37 = vadd.f32 %v2386_v49, %v526_v34  ;;  %v2080_v34 = vld [vmem:[#allocation4 + $0x110] sm:$0xff]  }
 0x115   : > { %v550_v53 = vmul.f32 %v542_v45, %v2419_v40 }
 0x116   : > { %v571_v3 = vmul.f32 0.7978846, %v563_v0  ;;  %v543_v41 = vmul.f32 %v2412_v37, %v2412_v37  ;;  %v636_v0 = vpop.permute.xlu1 %635 }
 0x117   : > { %v558_v59 = vmul.f32 0.044715, %v550_v53 }
 0x118   : > { %2103 = vtanh.f32 %v571_v3  ;;  %v551_v47 = vmul.f32 %v543_v41, %v2412_v37  ;;  %v2067_v3 = vld [vmem:[#allocation4 + $0xc0] sm:$0xff]  }
 0x119   : > { %2105 = vtanh.f32 %v573_v19  ;;  %v566_v4 = vadd.f32 %v558_v59, %v2419_v40  ;;  %v2075_v19 = vld [vmem:[#allocation4 + $0x160] sm:$0xff]   ;;  %v2090_v59 = vld [vmem:[#allocation4 + $0x1a8] sm:$0xff]  }
 0x11a   : > { %2107 = vtanh.f32 %v572_v27 }
 0x11b   : > { %v574_v10 = vmul.f32 0.7978846, %v566_v4  ;;  %v2094_v4 = vld [vmem:[#allocation4 + $0x198] sm:$0xff]  }
 0x121   : > { %v2102_v8 = vpop.eup %2101 }
 0x122   : > { %v586_v12 = vadd.f32 1.0, %v2102_v8  ;;  %v2069_v8 = vld [vmem:[#allocation4 + $0x178] sm:$0xff]  }
 0x124   : > { %v594_v13 = vmul.f32 0.5, %v586_v12  ;;  %v2071_v12 = vld [vmem:[#allocation4 + $0x170] sm:$0xff]  }
 0x125   : > { %v2104_v14 = vpop.eup %2103 }
 0x126   : > { %v587_v17 = vadd.f32 1.0, %v2104_v14  ;;  %v602_v18 = vmul.f32 %v594_v13, %v508_v51  ;;  %v2106_v42 = vpop.eup %2105  ;;  %v2062_v51 = vld [vmem:[#allocation4 + $0x98] sm:$0xff]   ;;  %v2072_v14 = vld [vmem:[#allocation4 + $0x130] sm:$0xff]  }
 0x127   : > { %v589_v46 = vadd.f32 1.0, %v2106_v42  ;;  %v2108_v48 = vpop.eup %2107  ;;  %v646_v42 = vpop.permute.xlu1 %645 }
 0x128   : > { %v595_v21 = vmul.f32 0.5, %v587_v17  ;;  %v658_v22 = vmul.f32 %v621_v20, %v602_v18  ;;  %v588_v54 = vadd.f32 1.0, %v2108_v48  ;;  %v2449_v17 = vadd.f32 %v2406_v28, %v2386_v49  ;;  %v2074_v18 = vld [vmem:[#allocation4 + $0x128] sm:$0xff]   ;;  %v2079_v28 = vld [vmem:[#allocation4 + $0x150] sm:$0xff]  }
 0x129   : > { %v597_v55 = vmul.f32 0.5, %v589_v46  ;;  %v2457_v20 = vadd.f32 %v2403_v15, %v2386_v49  ;;  %v2078_v15 = vld [vmem:[#allocation4 + $0x118] sm:$0xff]  }
 0x12a   : > { %v603_v25 = vmul.f32 %v595_v21, %v511_v56  ;;  %v666_v26 = vpack.c.bf16 %v658_v22, %v658_v22  ;;  %v559_v56 = vmul.f32 0.044715, %v551_v47  ;;  %v596_v60 = vmul.f32 0.5, %v588_v54 }
 0x12b   : > { %v605_v62 = vmul.f32 %v597_v55, %v2391_v61  ;;  %v2068_v61 = vld [vmem:[#allocation4 + $0x80] sm:$0xff]   ;;  %v545_v21 = vmul.f32 %v2449_v17, %v2449_v17  ;;  %v2087_v55 = vld [vmem:[#allocation4 + $0x1f0] sm:$0xff]  }
 0x12c   : > { %v659_v29 = vmul.f32 %v626_v9, %v603_v25  ;;  %1852 = vmatmul.mubr.bf16.vlgmr.msra.gmra.mxu0 %v666_v26  ;;  %v567_v63 = vadd.f32 %v559_v56, %v2412_v37  ;;  %v604_v5 = vmul.f32 %v596_v60, %v2394_v1  ;;  %v2070_v1 = vld [vmem:[#allocation4 + $0x138] sm:$0xff]   ;;  %v544_v25 = vmul.f32 %v2457_v20, %v2457_v20  ;;  %v2091_v60 = vld [vmem:[#allocation4 + $0x1e0] sm:$0xff]  }
 0x12d   : > { %1876 = vmatpush3.bf16.msra.mxu0 %v2053_v24  ;;  %1891 = vmatprep.mubr.msk.bf16.mxu0 %vm2214_vm2, %v2213_v32  ;;  %v661_v6 = vmul.f32 %v636_v0, %v605_v62  ;;  %v2077_v24 = vld [vmem:[#allocation4 + $0x158] sm:$0xff]   ;;  %v553_v26 = vmul.f32 %v545_v21, %v2449_v17 }
 0x12e   : > { %v683_v33 = vpack.c.bf16 %v659_v29, %v659_v29  ;;  %1877 = vmatprep.subr.bf16.mxu0 %v2213_v32  ;;  %v575_v7 = vmul.f32 0.7978846, %v567_v63  ;;  %v660_v9 = vmul.f32 %v631_v50, %v604_v5  ;;  %v552_v29 = vmul.f32 %v544_v25, %v2457_v20  ;;  %v2084_v50 = vld [vmem:[#allocation4 + $0x100] sm:$0xff]   ;;  %v2093_v0 = vld [vmem:[#allocation4 + $0x1d8] sm:$0xff]   ;;  %v2095_v5 = vld [vmem:[#allocation4 + $0x1d0] sm:$0xff]  }
 0x12f   : > { %v984_v11 = vpack.c.bf16 %v661_v6, %v661_v6  ;;  %v2092_v63 = vld [vmem:[#allocation4 + $0x1a0] sm:$0xff]  }
 0x130   : > { %1832 = vmatmul.mubr.bf16.vlgmr.msra.gmra.mxu1 %v683_v33  ;;  %2109 = vtanh.f32 %v575_v7  ;;  %v877_v13 = vpack.c.bf16 %v660_v9, %v660_v9 }
 0x131   : > { %1856 = vmatpush3.bf16.msra.mxu1 %v2054_v30  ;;  %1878 = vmatpush3.bf16.msra.mxu0 %v2055_v31  ;;  %2111 = vtanh.f32 %v574_v10  ;;  %v561_v31 = vmul.f32 0.044715, %v553_v26 }
 0x132   : > { %1857 = vmatprep.subr.bf16.mxu1 %v2213_v32  ;;  %1879 = vmatprep.subr.bf16.mxu0 %v2213_v32 }
 0x133   : > { %1871 = vmatprep.mubr.msk.bf16.mxu1 %vm2214_vm2, %v2213_v32 }
 0x135   : > { %1858 = vmatpush3.bf16.msra.mxu1 %v2056_v35  ;;  %1880 = vmatpush3.bf16.msra.mxu0 %v2057_v36  ;;  %v2081_v35 = vld [vmem:[#allocation4 + $0x148] sm:$0xff]   ;;  %v560_v36 = vmul.f32 0.044715, %v552_v29 }
 0x136   : > { %1859 = vmatprep.subr.bf16.mxu1 %v2213_v32  ;;  %1881 = vmatprep.subr.bf16.mxu0 %v2213_v32 }
 0x137   : > { %v568_v45 = vadd.f32 %v560_v36, %v2457_v20 }
 0x139   : > { %1860 = vmatpush3.bf16.msra.mxu1 %v2058_v38  ;;  %1882 = vmatpush3.bf16.msra.mxu0 %v2059_v39  ;;  %v569_v39 = vadd.f32 %v561_v31, %v2449_v17  ;;  %v576_v53 = vmul.f32 0.7978846, %v568_v45 }
 0x13a   : > { %1861 = vmatprep.subr.bf16.mxu1 %v2213_v32  ;;  %1883 = vmatprep.subr.bf16.mxu0 %v2213_v32 }
 0x13b   : > { %v577_v48 = vmul.f32 0.7978846, %v569_v39 }
 0x13d   : > { %1862 = vmatpush3.bf16.msra.mxu1 %v2060_v43  ;;  %1884 = vmatpush3.bf16.msra.mxu0 %v2061_v44  ;;  %v2110_v22 = vpop.eup %2109  ;;  %v2082_v43 = vld [vmem:[#allocation4 + $0x108] sm:$0xff]   ;;  %v2083_v44 = vld [vmem:[#allocation4 + $0x140] sm:$0xff]   ;;  %2113 = vtanh.f32 %v577_v48 }
 0x13e   : > { %1863 = vmatprep.subr.bf16.mxu1 %v2213_v32  ;;  %1885 = vmatprep.subr.bf16.mxu0 %v2213_v32  ;;  %v591_v27 = vadd.f32 1.0, %v2110_v22  ;;  %v2112_v49 = vpop.eup %2111  ;;  %2115 = vtanh.f32 %v576_v53 }
 0x13f   : > { %v590_v30 = vadd.f32 1.0, %v2112_v49 }
 0x140   : > { %v599_v33 = vmul.f32 0.5, %v591_v27 }
 0x141   : > { %1864 = vmatpush3.bf16.msra.mxu1 %v2062_v51  ;;  %1886 = vmatpush3.bf16.msra.mxu0 %v2063_v52  ;;  %v598_v38 = vmul.f32 0.5, %v590_v30  ;;  %v2085_v51 = vld [vmem:[#allocation4 + $0x1f8] sm:$0xff]  }
 0x142   : > { %1865 = vmatprep.subr.bf16.mxu1 %v2213_v32  ;;  %1887 = vmatprep.subr.bf16.mxu0 %v2213_v32  ;;  %v607_v41 = vmul.f32 %v599_v33, %v2412_v37  ;;  %v641_v37 = vpop.permute.xlu0 %640 }
 0x143   : > { %v606_v46 = vmul.f32 %v598_v38, %v2419_v40  ;;  %v2086_v40 = vld [vmem:[#allocation4 + $0x1b8] sm:$0xff]  }
 0x144   : > { %v663_v47 = vmul.f32 %v646_v42, %v607_v41 }
 0x145   : > { %1866 = vmatpush3.bf16.msra.mxu1 %v2064_v57  ;;  %1888 = vmatpush3.bf16.msra.mxu0 %v2065_v58  ;;  %v662_v52 = vmul.f32 %v641_v37, %v606_v46  ;;  %v2088_v57 = vld [vmem:[#allocation4 + $0x1b0] sm:$0xff]   ;;  %v2089_v58 = vld [vmem:[#allocation4 + $0x1e8] sm:$0xff]  }
 0x146   : > { %1867 = vmatprep.subr.bf16.mxu1 %v2213_v32  ;;  %1889 = vmatprep.subr.bf16.mxu0 %v2213_v32  ;;  %v1198_v54 = vpack.c.bf16 %v663_v47, %v663_v47 }
 0x147   : > { %v1091_v56 = vpack.c.bf16 %v662_v52, %v662_v52 }
 0x149   : > { %1868 = vmatpush3.bf16.msra.mxu1 %v2066_v2  ;;  %1890 = vmatpush3.bf16.msra.mxu0 %v2067_v3 }
 0x14a   : > { %1869 = vmatprep.subr.bf16.mxu1 %v2213_v32  ;;  %1915 = vmatprep.subr.bf16.mxu0 %v2213_v32  ;;  %v2114_v62 = vpop.eup %2113 }
 0x14b   : > { %v593_v2 = vadd.f32 1.0, %v2114_v62  ;;  %v2116_v3 = vpop.eup %2115 }
 0x14c   : > { %1892 = vmatmul.mubr.bf16.vlgmr.msra.gmra.mxu0 %v984_v11  ;;  %v592_v6 = vadd.f32 1.0, %v2116_v3  ;;  %v656_v11 = vpop.permute.xlu1 %655 }
 0x14d   : > { %1870 = vmatpush3.bf16.msra.mxu1 %v2068_v61  ;;  %1916 = vmatpush3.bf16.msra.mxu0 %v2069_v8  ;;  %v601_v7 = vmul.f32 0.5, %v593_v2  ;;  %v2096_v61 = vld [vmem:[#allocation4 + $0x190] sm:$0xff]   ;;  %v2097_v8 = vld [vmem:[#allocation4 + $0x1c8] sm:$0xff]  }
 0x14e   : > { %1895 = vmatprep.subr.bf16.mxu1 %v2213_v32  ;;  %1917 = vmatprep.subr.bf16.mxu0 %v2213_v32  ;;  %v600_v9 = vmul.f32 0.5, %v592_v6 }
 0x14f   : > { %1931 = vmatprep.mubr.msk.bf16.mxu0 %vm2214_vm2, %v2213_v32  ;;  %v609_v10 = vmul.f32 %v601_v7, %v2449_v17  ;;  %v2100_v17 = vld [vmem:[#allocation4 + $0x180] sm:$0xff]  }
 0x150   : > { %1872 = vmatmul.mubr.bf16.vlgmr.msra.gmra.mxu1 %v877_v13  ;;  %v608_v13 = vmul.f32 %v600_v9, %v2457_v20 }
 0x151   : > { %1896 = vmatpush3.bf16.msra.mxu1 %v2070_v1  ;;  %1918 = vmatpush3.bf16.msra.mxu0 %v2071_v12  ;;  %v2098_v1 = vld [vmem:[#allocation4 + $0x188] sm:$0xff]   ;;  %v2099_v12 = vld [vmem:[#allocation4 + $0x1c0] sm:$0xff]  }
 0x152   : > { %1897 = vmatprep.subr.bf16.mxu1 %v2213_v32  ;;  %1919 = vmatprep.subr.bf16.mxu0 %v2213_v32 }
 0x153   : > { %1911 = vmatprep.mubr.msk.bf16.mxu1 %vm2214_vm2, %v2213_v32 }
 0x155   : > { %1898 = vmatpush3.bf16.msra.mxu1 %v2072_v14  ;;  %1920 = vmatpush3.bf16.msra.mxu0 %v2073_v16  ;;  %v665_v14 = vmul.f32 %v656_v11, %v609_v10  ;;  %v651_v16 = vpop.permute.xlu0 %650 }
 0x156   : > { %1899 = vmatprep.subr.bf16.mxu1 %v2213_v32  ;;  %1921 = vmatprep.subr.bf16.mxu0 %v2213_v32 }
 0x159   : > { %1900 = vmatpush3.bf16.msra.mxu1 %v2074_v18  ;;  %1922 = vmatpush3.bf16.msra.mxu0 %v2075_v19  ;;  %v664_v18 = vmul.f32 %v651_v16, %v608_v13  ;;  %v1412_v19 = vpack.c.bf16 %v665_v14, %v665_v14 }
 0x15a   : > { %1901 = vmatprep.subr.bf16.mxu1 %v2213_v32  ;;  %1923 = vmatprep.subr.bf16.mxu0 %v2213_v32 }
 0x15b   : > { %v1305_v21 = vpack.c.bf16 %v664_v18, %v664_v18 }
 0x15d   : > { %1902 = vmatpush3.bf16.msra.mxu1 %v2076_v23  ;;  %1924 = vmatpush3.bf16.msra.mxu0 %v2077_v24 }
 0x15e   : > { %1903 = vmatprep.subr.bf16.mxu1 %v2213_v32  ;;  %1925 = vmatprep.subr.bf16.mxu0 %v2213_v32 }
 0x161   : > { %1904 = vmatpush3.bf16.msra.mxu1 %v2078_v15  ;;  %1926 = vmatpush3.bf16.msra.mxu0 %v2079_v28 }
 0x162   : > { %1905 = vmatprep.subr.bf16.mxu1 %v2213_v32  ;;  %1927 = vmatprep.subr.bf16.mxu0 %v2213_v32 }
 0x165   : > { %1906 = vmatpush3.bf16.msra.mxu1 %v2080_v34  ;;  %1928 = vmatpush3.bf16.msra.mxu0 %v2081_v35 }
 0x166   : > { %1907 = vmatprep.subr.bf16.mxu1 %v2213_v32  ;;  %1929 = vmatprep.subr.bf16.mxu0 %v2213_v32 }
 0x169   : > { %1908 = vmatpush3.bf16.msra.mxu1 %v2082_v43  ;;  %1930 = vmatpush3.bf16.msra.mxu0 %v2083_v44 }
 0x16a   : > { %1909 = vmatprep.subr.bf16.mxu1 %v2213_v32  ;;  %1955 = vmatprep.subr.bf16.mxu0 %v2213_v32 }
 0x16c   : > { %1932 = vmatmul.mubr.bf16.vlgmr.msra.gmra.mxu0 %v1198_v54 }
 0x16d   : > { %1910 = vmatpush3.bf16.msra.mxu1 %v2084_v50  ;;  %1956 = vmatpush3.bf16.msra.mxu0 %v2085_v51 }
 0x16e   : > { %1935 = vmatprep.subr.bf16.mxu1 %v2213_v32  ;;  %1957 = vmatprep.subr.bf16.mxu0 %v2213_v32 }
 0x16f   : > { %1971 = vmatprep.mubr.msk.bf16.mxu0 %vm2214_vm2, %v2213_v32 }
 0x170   : > { %1912 = vmatmul.mubr.bf16.vlgmr.msra.gmra.mxu1 %v1091_v56 }
 0x171   : > { %1936 = vmatpush3.bf16.msra.mxu1 %v2086_v40  ;;  %1958 = vmatpush3.bf16.msra.mxu0 %v2087_v55  ;;  %v1723_v40 = vld [vmem:[%s2552_s5] ss:$0 sm:$0xff] }
 0x172   : > { %1937 = vmatprep.subr.bf16.mxu1 %v2213_v32  ;;  %1959 = vmatprep.subr.bf16.mxu0 %v2213_v32 }
 0x173   : > { %1951 = vmatprep.mubr.msk.bf16.mxu1 %vm2214_vm2, %v2213_v32 }
 0x175   : > { %1938 = vmatpush3.bf16.msra.mxu1 %v2088_v57  ;;  %1960 = vmatpush3.bf16.msra.mxu0 %v2089_v58 }
 0x176   : > { %1939 = vmatprep.subr.bf16.mxu1 %v2213_v32  ;;  %1961 = vmatprep.subr.bf16.mxu0 %v2213_v32 }
 0x179   : > { %1940 = vmatpush3.bf16.msra.mxu1 %v2090_v59  ;;  %1962 = vmatpush3.bf16.msra.mxu0 %v2091_v60 }
 0x17a   : > { %1941 = vmatprep.subr.bf16.mxu1 %v2213_v32  ;;  %1963 = vmatprep.subr.bf16.mxu0 %v2213_v32 }
 0x17d   : > { %1942 = vmatpush3.bf16.msra.mxu1 %v2092_v63  ;;  %1964 = vmatpush3.bf16.msra.mxu0 %v2093_v0 }
 0x17e   : > { %1943 = vmatprep.subr.bf16.mxu1 %v2213_v32  ;;  %1965 = vmatprep.subr.bf16.mxu0 %v2213_v32 }
 0x181   : > { %1944 = vmatpush3.bf16.msra.mxu1 %v2094_v4  ;;  %1966 = vmatpush3.bf16.msra.mxu0 %v2095_v5 }
 0x182   : > { %1945 = vmatprep.subr.bf16.mxu1 %v2213_v32  ;;  %1967 = vmatprep.subr.bf16.mxu0 %v2213_v32 }
 0x185   : > { %1946 = vmatpush3.bf16.msra.mxu1 %v2096_v61  ;;  %1968 = vmatpush3.bf16.msra.mxu0 %v2097_v8 }
 0x186   : > { %1947 = vmatprep.subr.bf16.mxu1 %v2213_v32  ;;  %1969 = vmatprep.subr.bf16.mxu0 %v2213_v32 }
 0x189   : > { %1948 = vmatpush3.bf16.msra.mxu1 %v2098_v1  ;;  %1970 = vmatpush3.bf16.msra.mxu0 %v2099_v12 }
 0x18a   : > { %1949 = vmatprep.subr.bf16.mxu1 %v2213_v32 }
 0x18c   : > { %1972 = vmatmul.mubr.bf16.vlgmr.msra.gmra.mxu0 %v1412_v19 }
 0x18d   : > { %1950 = vmatpush3.bf16.msra.mxu1 %v2100_v17 }
 0x190   : > { %1952 = vmatmul.mubr.bf16.vlgmr.msra.gmra.mxu1 %v1305_v21 }
 0x1ec   : > { %v871_v22 = vpop.f32.mrf.mxu0 }
 0x1ee   : > { %v1853_v23 = vpop.f32.mrf.mxu0 }
 0x1f0   : > { %v783_v20 = vpop.f32.mrf.mxu1  ;;  %v874_v24 = vpop.f32.mrf.mxu0 }
 0x1f1   : > { %v872_v25 = vadd.f32 %v871_v22, %v783_v20 }
 0x1f2   : > { %v1833_v26 = vpop.f32.mrf.mxu1  ;;  %v1854_v27 = vpop.f32.mrf.mxu0 }
 0x1f4   : > { %v786_v49 = vpop.f32.mrf.mxu1 }
 0x1f6   : > { %v1834_v15 = vpop.f32.mrf.mxu1 }
 0x20c   : > { %v1084_v28 = vpop.f32.mrf.mxu0 }
 0x20e   : > { %v1893_v29 = vpop.f32.mrf.mxu0 }
 0x210   : > { %v977_v30 = vpop.f32.mrf.mxu1  ;;  %v1087_v31 = vpop.f32.mrf.mxu0 }
 0x211   : > { %v983_v46 = vadd.f32 %v977_v30, %v872_v25 }
 0x212   : > { %v1873_v33 = vpop.f32.mrf.mxu1  ;;  %v1894_v32 = vpop.f32.mrf.mxu0 }
 0x213   : > { %v1090_v47 = vadd.f32 %v1084_v28, %v983_v46 }
 0x214   : > { %v980_v34 = vpop.f32.mrf.mxu1 }
 0x216   : > { %v1874_v35 = vpop.f32.mrf.mxu1 }
 0x22c   : > { %v1298_v36 = vpop.f32.mrf.mxu0 }
 0x22e   : > { %v1933_v38 = vpop.f32.mrf.mxu0 }
 0x230   : > { %v1191_v39 = vpop.f32.mrf.mxu1  ;;  %v1301_v41 = vpop.f32.mrf.mxu0 }
 0x231   : > { %v1197_v48 = vadd.f32 %v1191_v39, %v1090_v47 }
 0x232   : > { %v1913_v42 = vpop.f32.mrf.mxu1  ;;  %v1934_v43 = vpop.f32.mrf.mxu0 }
 0x233   : > { %v1304_v51 = vadd.f32 %v1298_v36, %v1197_v48 }
 0x234   : > { %v1194_v44 = vpop.f32.mrf.mxu1 }
 0x236   : > { %v1914_v45 = vpop.f32.mrf.mxu1 }
 0x24c   : > { %v1512_v37 = vpop.f32.mrf.mxu0 }
 0x24e   : > { %v1973_v50 = vpop.f32.mrf.mxu0 }
 0x250   : > { %v1405_v52 = vpop.f32.mrf.mxu1  ;;  %v1515_v53 = vpop.f32.mrf.mxu0 }
 0x251   : > { %v1411_v54 = vadd.f32 %v1405_v52, %v1304_v51 }
 0x252   : > { %v1953_v55 = vpop.f32.mrf.mxu1  ;;  %v1974_v56 = vpop.f32.mrf.mxu0 }
 0x253   : > { %v1518_v57 = vadd.f32 %v1512_v37, %v1411_v54 }
 0x254   : > { %v1408_v58 = vpop.f32.mrf.mxu1 }
 0x255   : > { %v1526_v59 = vadd.f32 %v1723_v40, %v1518_v57 }
 0x256   : > { %v1954_v60 = vpop.f32.mrf.mxu1 }
 0x257   : > { %1527 = vst [vmem:[%s418_s17] sm:$0xff] %v1526_v59 }
 0x258   : > { %2156 = shalt.err (!%p2153_p1)
}
 0x259   : > { %s2157_s12 = scalar_lea.hbm %s2510_s26, 128  ;;  %s2161_s14 = scalar_lea.hbm %s2553_s6, 256 }
 0x25a   : > { %p2158_p2 = scmp.ne.s32.totalorder %s2510_s26, %s2157_s12  ;;  %p2162_p7 = scmp.lt.s32.totalorder %s2510_s26, %s2553_s6 }
 0x25b   : > { %p2163_p8 = scmp.lt.s32.totalorder %s2161_s14, %s2157_s12 }
 0x25c   : > { %p2159_p3 = pnand %p2158_p2, %p2559_p6 }
 0x25d   : > { %p2164_p5 = por %p2163_p8, %p2162_p7 }
 0x25e   : > { %p2160_p4 = pneg %p2159_p3 }
 0x260   : > { %p2165_p10 = pnand %p2164_p5, %p2160_p4 }
 0x262   : > { %2168 = shalt.err (!%p2165_p10)
}
 0x263   : > { %1980 = dma.vmem_to_hbm [thread:$0]  (%p2559_p6), %s1543_s18, 128, %s2510_s26, %s1529_s28  }
 0x264 PF: > { %s1554_s17 = sand.u32 1, %s2195_s21   ;;  %p2560_p11 = scmp.ne.s32.totalorder %s2557_s9, 0 }
 0x265   : > { %s1555_s19 = scalar_lea.sflag [#allocation6], %s1554_s17 }
 0x266   : > { %p1987_p12 = pnand %p1640_p9, %p2560_p11 }
 0x268   : > { %p1988_p13 = pneg %p1987_p12 }
 0x26a   : > { %2190 = dma.done.wait (%p1988_p13), %s1555_s19, 128  }
 0x26b   : > { %2192 = vsyncadd (%p1988_p13), %s1555_s19, 4294967168  ;;  %p17_p0 = scmp.ge.s32.totalorder %s2276_s27, 4   ;;  %s2561_s21 = smov %s2199_s22 }
 0x26c   : > { %s2562_s22 = smov %s2203_s23  ;;  %s2563_s23 = smov %s2288_s30 }
 0x26d   : > { %s2564_s24 = smov %s2276_s27  ;;  %19 = sbr.rel (!%p17_p0) target bundleno = 4 (0x4), region = 183 }
 0x272   :  { %1560 = vsyncpa [#allocation5], 1 }
 0x273   :  { %1562 = vsyncpa [#allocation5 + $0x1], 1 }
 0x274   :  { %1563 = vsyncpa [#allocation6], 1 }
 0x275   :  { %1565 = vsyncpa [#allocation6 + $0x1], 1 }

</bundles_post_ra>
